<compile_context>
chip_gen: v7x
topology: tpu7x:2x2x1
jax: 0.10.0
libtpu: 0.0.40
codegen_flags: <defaults>
</compile_context>

<pallas_src>
import jax
import jax.numpy as jnp
import numpy as np
from jax.experimental import pallas as pl
from jax.experimental.pallas import tpu as pltpu

K = 24              # SMPL joints
NB = 10             # shape (beta) coefficients
NP = (K - 1) * 9    # 207 pose blendshape coefficients

# standard SMPL kinematic tree (parent of joint i); parent[0] is the root
PARENT = [-1, 0, 0, 0, 1, 2, 3, 4, 5, 6, 7, 8, 9, 9, 9, 12, 13, 14,
          16, 17, 18, 19, 20, 21]


# --------------------------- Pallas kernels --------------------------------

def _shape_kernel(betas_ref, sd_ref, vt_ref, jregT_ref, vshaped_ref, jpart_ref):
    """Shape blendshapes + J-regressor partials for one vertex tile.

    betas [N,10] f32, sd [3,10,TV] bf16, vt [3,TV] f32, jregT [TV,24] f32
    outputs: vshaped [3,N,TV] f32, jpart [1,3,N,24] f32 (per-block partial)
    """
    betas = betas_ref[...].astype(sd_ref.dtype)   # bf16 MXU, f32 accumulate
    jregT = jregT_ref[...]
    jcs = []
    for c in range(3):
        vs_c = jnp.dot(betas, sd_ref[c],
                       preferred_element_type=jnp.float32) + vt_ref[c][None, :]
        vshaped_ref[c] = vs_c
        jcs.append(jnp.dot(vs_c, jregT, preferred_element_type=jnp.float32))
    jpart_ref[0] = jnp.stack(jcs, axis=0)          # [3, N, 24]


def _lbs_kernel(lrot_ref, G_ref, trans_ref, vshaped_ref, pd_ref, w_ref,
                jregT_ref, res_ref, jpart_ref):
    """Pose blendshapes + linear blend skinning + joint regression (per tile).

    lrot [N,207] f32, G [16,N,24] f32, trans [N,3] f32,
    vshaped [3,N,TV] f32, pd [3,207,TV] bf16, w [24,TV] f32, jregT [TV,24] f32
    outputs: res [3,N,TV] f32, jpart [1,3,N,24] f32 (per-block partial)
    """
    lrot = lrot_ref[...].astype(pd_ref.dtype)      # bf16 MXU, f32 accumulate
    trans = trans_ref[...]
    w = w_ref[...]
    jregT = jregT_ref[...]

    rest = [vshaped_ref[c] +
            jnp.dot(lrot, pd_ref[c], preferred_element_type=jnp.float32)
            for c in range(3)]

    jcs = []
    for a in range(3):
        # homogeneous coordinate rest[3] == 1 -> no broadcast / multiply.
        acc = jnp.dot(G_ref[4 * a + 3], w, preferred_element_type=jnp.float32)
        for b in range(3):
            Tab = jnp.dot(G_ref[4 * a + b], w,
                          preferred_element_type=jnp.float32)   # [N, TV]
            acc = acc + Tab * rest[b]
        r_a = acc + trans[:, a:a + 1]
        res_ref[a] = r_a
        jcs.append(jnp.dot(r_a, jregT, preferred_element_type=jnp.float32))
    jpart_ref[0] = jnp.stack(jcs, axis=0)          # [3, N, 24]


# --------------------------- plain-JAX glue ---------------------------------

def rodrigues(r):
    # r: [M, 1, 3] axis-angle -> [M, 3, 3] rotation matrices.
    # TODO(synk): PyTorch adds Gaussian noise (std=1e-8) before the norm;
    # we use a deterministic 1e-8 offset instead.
    eps = 1e-8
    theta = jnp.sqrt(jnp.sum((r + eps) ** 2, axis=(1, 2), keepdims=True))
    r_hat = r / theta
    cos = jnp.cos(theta)
    z = jnp.zeros_like(r_hat[:, 0, 0])
    m = jnp.stack([z, -r_hat[:, 0, 2], r_hat[:, 0, 1],
                   r_hat[:, 0, 2], z, -r_hat[:, 0, 0],
                   -r_hat[:, 0, 1], r_hat[:, 0, 0], z], axis=1).reshape(-1, 3, 3)
    i_cube = jnp.eye(3, dtype=r.dtype)[None]
    dot = jnp.matmul(jnp.transpose(r_hat, (0, 2, 1)), r_hat)
    return cos * i_cube + (1.0 - cos) * dot + jnp.sin(theta) * m


def with_zeros(x):
    ones = jnp.broadcast_to(
        jnp.array([[[0.0, 0.0, 0.0, 1.0]]], dtype=x.dtype), (x.shape[0], 1, 4))
    return jnp.concatenate([x, ones], axis=1)


def pack(x):
    zeros43 = jnp.zeros((x.shape[0], x.shape[1], 4, 3), dtype=x.dtype)
    return jnp.concatenate([zeros43, x], axis=3)


def lR2G(lRs, J):
    B = lRs.shape[0]
    results = [with_zeros(jnp.concatenate(
        [lRs[:, 0], J[:, 0, :].reshape(-1, 3, 1)], axis=2))]
    for i in range(1, K):
        results.append(jnp.matmul(
            results[PARENT[i]],
            with_zeros(jnp.concatenate(
                [lRs[:, i],
                 (J[:, i, :] - J[:, PARENT[i], :]).reshape(-1, 3, 1)], axis=2))))
    stacked = jnp.stack(results, axis=1)                     # [B, 24, 4, 4]
    J_h = jnp.concatenate([J, jnp.zeros((B, K, 1), J.dtype)],
                          axis=2).reshape(B, K, 4, 1)
    deformed = jnp.matmul(stacked, J_h)
    return stacked - pack(deformed), lRs


# --------------------------- forward wrapper --------------------------------

def _pad_vertices(x, axis, vp):
    v = x.shape[axis]
    if v == vp:
        return x
    pads = [(0, 0)] * x.ndim
    pads[axis] = (0, vp - v)
    return jnp.pad(x, pads)


def smpl_forward(betas, thetas, trans, p, tv=512):
    """SMPL forward. tv = vertex tile (lanes); V is zero-padded to a multiple."""
    assert tv % 128 == 0, "vertex tile must be a multiple of 128 lanes"
    N = betas.shape[0]
    V = p['v_template'].shape[0]
    Vp = ((V + tv - 1) // tv) * tv          # pad vertex axis to a tile multiple
    nb = Vp // tv
    grid = (nb,)
    f32, bf16 = jnp.float32, jnp.bfloat16

    # kernel-layout parameter tensors (vertex axis last, zero padded to Vp).
    # The big streamed tensors (posedirs ~94% of traffic, shapedirs) go bf16;
    # every dot keeps preferred_element_type=f32 so accumulation stays f32.
    sd_l = jnp.transpose(_pad_vertices(p['shapedirs'], 0, Vp),
                         (1, 2, 0)).astype(bf16)                 # [3, 10, Vp]
    pd_l = jnp.transpose(_pad_vertices(p['posedirs'], 0, Vp),
                         (1, 2, 0)).astype(bf16)                 # [3, 207, Vp]
    vt_l = jnp.transpose(_pad_vertices(p['v_template'], 0, Vp), (1, 0))   # [3, Vp]
    jregT_l = jnp.transpose(_pad_vertices(p['J_regressor'], 1, Vp), (1, 0))  # [Vp,24]
    w_l = jnp.transpose(_pad_vertices(p['weights'], 0, Vp), (1, 0))       # [24, Vp]
    jr_l = _pad_vertices(p['joint_regressor'], 0, Vp)                     # [Vp, 24]

    cost1 = pl.CostEstimate(
        flops=2 * N * NB * Vp * 3 + 2 * N * Vp * K * 3,
        transcendentals=0,
        bytes_accessed=(N * NB * 4 + 3 * NB * Vp * 2 + 3 * Vp * 4 + Vp * K * 4
                        + 3 * N * Vp * 4 + nb * 3 * N * K * 4))

    # Kernel 1: v_shaped = betas . shapedirs + v_template ; per-block J partials
    vshaped_l, jpart1 = pl.pallas_call(
        _shape_kernel,
        out_shape=(jax.ShapeDtypeStruct((3, N, Vp), f32),
                   jax.ShapeDtypeStruct((nb, 3, N, K), f32)),
        grid_spec=pltpu.PrefetchScalarGridSpec(
            num_scalar_prefetch=0, grid=grid,
            in_specs=[
                pl.BlockSpec((N, NB), lambda i: (0, 0)),
                pl.BlockSpec((3, NB, tv), lambda i: (0, 0, i)),
                pl.BlockSpec((3, tv), lambda i: (0, i)),
                pl.BlockSpec((tv, K), lambda i: (i, 0)),
            ],
            out_specs=[
                pl.BlockSpec((3, N, tv), lambda i: (0, 0, i)),
                pl.BlockSpec((1, 3, N, K), lambda i: (i, 0, 0, 0)),
            ]),
        compiler_params=pltpu.CompilerParams(
            dimension_semantics=("parallel",)),
        cost_estimate=cost1,
    )(betas, sd_l, vt_l, jregT_l)
    J = jnp.transpose(jnp.sum(jpart1, axis=0), (1, 2, 0))    # [N, 24, 3]

    # tiny kinematic chain (plain JAX)
    lRs = rodrigues(thetas.reshape(-1, 1, 3)).reshape(N, K, 3, 3)
    G, R_cube_big = lR2G(lRs, J)
    lrotmin = (R_cube_big[:, 1:] -
               jnp.eye(3, dtype=betas.dtype)[None, None]).reshape(N, -1)
    G16 = jnp.transpose(G.reshape(N, K, 16), (2, 0, 1))      # [16, N, 24]

    cost2 = pl.CostEstimate(
        flops=(2 * N * NP * Vp * 3 + 12 * 2 * N * K * Vp + 2 * N * Vp * K * 3
               + 8 * N * Vp * 3),
        transcendentals=0,
        bytes_accessed=(N * NP * 4 + 16 * N * K * 4 + N * 3 * 4
                        + 3 * N * Vp * 4 + 3 * NP * Vp * 2 + K * Vp * 4
                        + Vp * K * 4 + 3 * N * Vp * 4 + nb * 3 * N * K * 4))

    # Kernel 2: pose blendshapes + LBS + translation + joint-regressor partials
    res_l, jpart2 = pl.pallas_call(
        _lbs_kernel,
        out_shape=(jax.ShapeDtypeStruct((3, N, Vp), f32),
                   jax.ShapeDtypeStruct((nb, 3, N, K), f32)),
        grid_spec=pltpu.PrefetchScalarGridSpec(
            num_scalar_prefetch=0, grid=grid,
            in_specs=[
                pl.BlockSpec((N, NP), lambda i: (0, 0)),
                pl.BlockSpec((16, N, K), lambda i: (0, 0, 0)),
                pl.BlockSpec((N, 3), lambda i: (0, 0)),
                pl.BlockSpec((3, N, tv), lambda i: (0, 0, i)),
                pl.BlockSpec((3, NP, tv), lambda i: (0, 0, i)),
                pl.BlockSpec((K, tv), lambda i: (0, i)),
                pl.BlockSpec((tv, K), lambda i: (i, 0)),
            ],
            out_specs=[
                pl.BlockSpec((3, N, tv), lambda i: (0, 0, i)),
                pl.BlockSpec((1, 3, N, K), lambda i: (i, 0, 0, 0)),
            ]),
        compiler_params=pltpu.CompilerParams(
            dimension_semantics=("parallel",)),
        cost_estimate=cost2,
    )(lrotmin, G16, trans, vshaped_l, pd_l, w_l, jr_l)

    result = jnp.transpose(res_l, (1, 2, 0))[:, :V, :]        # [N, V, 3]
    joints = jnp.transpose(jnp.sum(jpart2, axis=0), (1, 2, 0))  # [N, 24, 3]
    return result, joints


# --------------------------- pure-JAX reference ------------------------------

def reference_forward(betas, thetas, trans, p):
    N = betas.shape[0]
    v_shaped = jnp.tensordot(betas, p['shapedirs'],
                             axes=([1], [2])) + p['v_template']
    J = jnp.matmul(p['J_regressor'], v_shaped)
    lRs = rodrigues(thetas.reshape(-1, 1, 3)).reshape(N, K, 3, 3)
    G, R_cube_big = lR2G(lRs, J)
    lrotmin = (R_cube_big[:, 1:] -
               jnp.eye(3, dtype=betas.dtype)[None, None]).reshape(N, -1)
    v_posed = v_shaped + jnp.tensordot(lrotmin, p['posedirs'], axes=([1], [2]))
    T = jnp.tensordot(G, p['weights'], axes=([1], [1])).transpose(0, 3, 1, 2)
    rest_h = jnp.concatenate(
        [v_posed, jnp.ones((N, v_posed.shape[1], 1), betas.dtype)], axis=2)
    v = jnp.matmul(T, rest_h.reshape(N, -1, 4, 1)).reshape(N, -1, 4)[:, :, :3]
    result = v + trans.reshape(N, 1, 3)
    joints = jnp.tensordot(result, p['joint_regressor'],
                           axes=([1], [0])).transpose(0, 2, 1)
    return result, joints


# --------------------------------- main --------------------------------------

if __name__ == "__main__":
    key = jax.random.PRNGKey(0)
    ks = jax.random.split(key, 10)
    # V=500 (not a tile multiple) exercises the padding path; real SMPL is 6890.
    N, V = 2, 500

    params = {
        'J_regressor': jax.random.uniform(ks[0], (K, V), jnp.float32) / V,
        'joint_regressor': jax.random.uniform(ks[1], (V, K), jnp.float32) / V,
        'weights': jax.nn.softmax(jax.random.normal(ks[2], (V, K), jnp.float32),
                                  axis=-1),
        'posedirs': 0.01 * jax.random.normal(ks[3], (V, 3, NP), jnp.float32),
        'v_template': jax.random.normal(ks[4], (V, 3), jnp.float32),
        'shapedirs': 0.1 * jax.random.normal(ks[5], (V, 3, NB), jnp.float32),
    }
    betas = jax.random.normal(ks[6], (N, NB), jnp.float32)
    thetas = 0.3 * jax.random.normal(ks[7], (N, K * 3), jnp.float32)
    trans = jax.random.normal(ks[8], (N, 3), jnp.float32)

    # tv=256 at this toy size -> 2 vertex blocks (tests partial-sum reduction
    # and padding); at real SMPL scale use the default tv=512 (or 1024).
    result, joints = smpl_forward(betas, thetas, trans, params, tv=256)
    jax.block_until_ready((result, joints))

    ref_result, ref_joints = reference_forward(betas, thetas, trans, params)
    assert result.shape == (N, V, 3) and joints.shape == (N, K, 3)
    assert np.allclose(np.asarray(result), np.asarray(ref_result),
                       rtol=1e-2, atol=1e-2)
    assert np.allclose(np.asarray(joints), np.asarray(ref_joints),
                       rtol=1e-2, atol=1e-2)
    print("KERNEL_OK")
</pallas_src>

<mosaic_0001>
module attributes {stable_mosaic.version = 11 : i64} {
  func.func @_shape_kernel(%arg0: i32, %arg1: memref<2x10xf32, #tpu.memory_space<vmem>>, %arg2: memref<3x10x256xbf16, #tpu.memory_space<vmem>>, %arg3: memref<3x256xf32, #tpu.memory_space<vmem>>, %arg4: memref<256x24xf32, #tpu.memory_space<vmem>>, %arg5: memref<3x2x256xf32, #tpu.memory_space<vmem>>, %arg6: memref<1x3x2x24xf32, #tpu.memory_space<vmem>>) attributes {dimension_semantics = [#tpu.dimension_semantics<parallel>], iteration_bounds = array<i64: 2>, scalar_prefetch = 0 : i64, scratch_operands = 0 : i64, tpu.core_type = #tpu.core_type<tc>, window_params = [{pipeline_mode = #tpu.pipeline_mode<synchronous>, transform_indices = @transform_0, window_bounds = array<i64: 2, 10>}, {transform_indices = @transform_1, window_bounds = array<i64: 3, 10, 256>}, {transform_indices = @transform_2, window_bounds = array<i64: 3, 256>}, {transform_indices = @transform_3, window_bounds = array<i64: 256, 24>}, {transform_indices = @transform_4, window_bounds = array<i64: 3, 2, 256>}, {transform_indices = @transform_5, window_bounds = array<i64: 1, 3, 2, 24>}]} {
    %c0 = arith.constant 0 : index
    %c0_0 = arith.constant 0 : index
    %0 = vector.load %arg1[%c0, %c0_0] : memref<2x10xf32, #tpu.memory_space<vmem>>, vector<2x10xf32>
    %1 = arith.truncf %0 : vector<2x10xf32> to vector<2x10xbf16>
    %c0_1 = arith.constant 0 : index
    %c0_2 = arith.constant 0 : index
    %2 = vector.load %arg4[%c0_1, %c0_2] : memref<256x24xf32, #tpu.memory_space<vmem>>, vector<256x24xf32>
    %c0_3 = arith.constant 0 : index
    %c0_4 = arith.constant 0 : index
    %c0_5 = arith.constant 0 : index
    %3 = vector.load %arg2[%c0_3, %c0_4, %c0_5] : memref<3x10x256xbf16, #tpu.memory_space<vmem>>, vector<1x10x256xbf16>
    %4 = vector.shape_cast %3 : vector<1x10x256xbf16> to vector<10x256xbf16>
    %cst = arith.constant dense<0.000000e+00> : vector<2x256xf32>
    %5 = tpu.matmul %1, %4, %cst {dimension_numbers = #tpu.dot_dimension_numbers<[1], [0], [0], [1], [0, 0, 1, 1], [], []>} : vector<2x10xbf16>, vector<10x256xbf16>, vector<2x256xf32> -> vector<2x256xf32>
    %c0_6 = arith.constant 0 : index
    %c0_7 = arith.constant 0 : index
    %6 = vector.load %arg3[%c0_6, %c0_7] : memref<3x256xf32, #tpu.memory_space<vmem>>, vector<1x256xf32>
    %7 = vector.shape_cast %6 : vector<1x256xf32> to vector<256xf32>
    %8 = vector.shape_cast %7 : vector<256xf32> to vector<1x256xf32>
    %9 = vector.broadcast %8 : vector<1x256xf32> to vector<2x256xf32>
    %10 = arith.addf %5, %9 : vector<2x256xf32>
    %c0_8 = arith.constant 0 : index
    %c0_9 = arith.constant 0 : index
    %c0_10 = arith.constant 0 : index
    %11 = vector.load %arg5[%c0_8, %c0_9, %c0_10] : memref<3x2x256xf32, #tpu.memory_space<vmem>>, vector<1x2x256xf32>
    %12 = vector.shape_cast %11 : vector<1x2x256xf32> to vector<2x256xf32>
    %13 = vector.shape_cast %10 : vector<2x256xf32> to vector<1x2x256xf32>
    tpu.vector_store %arg5[%c0_8, %c0_9, %c0_10], %13 {strides = array<i32>} : memref<3x2x256xf32, #tpu.memory_space<vmem>>, vector<1x2x256xf32>,
    %cst_11 = arith.constant dense<0.000000e+00> : vector<2x24xf32>
    %14 = tpu.matmul %10, %2, %cst_11 {dimension_numbers = #tpu.dot_dimension_numbers<[1], [0], [0], [1], [0, 0, 1, 1], [], []>} : vector<2x256xf32>, vector<256x24xf32>, vector<2x24xf32> -> vector<2x24xf32>
    %c1 = arith.constant 1 : index
    %c0_12 = arith.constant 0 : index
    %c0_13 = arith.constant 0 : index
    %15 = vector.load %arg2[%c1, %c0_12, %c0_13] : memref<3x10x256xbf16, #tpu.memory_space<vmem>>, vector<1x10x256xbf16>
    %16 = vector.shape_cast %15 : vector<1x10x256xbf16> to vector<10x256xbf16>
    %cst_14 = arith.constant dense<0.000000e+00> : vector<2x256xf32>
    %17 = tpu.matmul %1, %16, %cst_14 {dimension_numbers = #tpu.dot_dimension_numbers<[1], [0], [0], [1], [0, 0, 1, 1], [], []>} : vector<2x10xbf16>, vector<10x256xbf16>, vector<2x256xf32> -> vector<2x256xf32>
    %c1_15 = arith.constant 1 : index
    %c0_16 = arith.constant 0 : index
    %18 = vector.load %arg3[%c1_15, %c0_16] : memref<3x256xf32, #tpu.memory_space<vmem>>, vector<1x256xf32>
    %19 = vector.shape_cast %18 : vector<1x256xf32> to vector<256xf32>
    %20 = vector.shape_cast %19 : vector<256xf32> to vector<1x256xf32>
    %21 = vector.broadcast %20 : vector<1x256xf32> to vector<2x256xf32>
    %22 = arith.addf %17, %21 : vector<2x256xf32>
    %c1_17 = arith.constant 1 : index
    %c0_18 = arith.constant 0 : index
    %c0_19 = arith.constant 0 : index
    %23 = vector.load %arg5[%c1_17, %c0_18, %c0_19] : memref<3x2x256xf32, #tpu.memory_space<vmem>>, vector<1x2x256xf32>
    %24 = vector.shape_cast %23 : vector<1x2x256xf32> to vector<2x256xf32>
    %25 = vector.shape_cast %22 : vector<2x256xf32> to vector<1x2x256xf32>
    tpu.vector_store %arg5[%c1_17, %c0_18, %c0_19], %25 {strides = array<i32>} : memref<3x2x256xf32, #tpu.memory_space<vmem>>, vector<1x2x256xf32>,
    %cst_20 = arith.constant dense<0.000000e+00> : vector<2x24xf32>
    %26 = tpu.matmul %22, %2, %cst_20 {dimension_numbers = #tpu.dot_dimension_numbers<[1], [0], [0], [1], [0, 0, 1, 1], [], []>} : vector<2x256xf32>, vector<256x24xf32>, vector<2x24xf32> -> vector<2x24xf32>
    %c2 = arith.constant 2 : index
    %c0_21 = arith.constant 0 : index
    %c0_22 = arith.constant 0 : index
    %27 = vector.load %arg2[%c2, %c0_21, %c0_22] : memref<3x10x256xbf16, #tpu.memory_space<vmem>>, vector<1x10x256xbf16>
    %28 = vector.shape_cast %27 : vector<1x10x256xbf16> to vector<10x256xbf16>
    %cst_23 = arith.constant dense<0.000000e+00> : vector<2x256xf32>
    %29 = tpu.matmul %1, %28, %cst_23 {dimension_numbers = #tpu.dot_dimension_numbers<[1], [0], [0], [1], [0, 0, 1, 1], [], []>} : vector<2x10xbf16>, vector<10x256xbf16>, vector<2x256xf32> -> vector<2x256xf32>
    %c2_24 = arith.constant 2 : index
    %c0_25 = arith.constant 0 : index
    %30 = vector.load %arg3[%c2_24, %c0_25] : memref<3x256xf32, #tpu.memory_space<vmem>>, vector<1x256xf32>
    %31 = vector.shape_cast %30 : vector<1x256xf32> to vector<256xf32>
    %32 = vector.shape_cast %31 : vector<256xf32> to vector<1x256xf32>
    %33 = vector.broadcast %32 : vector<1x256xf32> to vector<2x256xf32>
    %34 = arith.addf %29, %33 : vector<2x256xf32>
    %c2_26 = arith.constant 2 : index
    %c0_27 = arith.constant 0 : index
    %c0_28 = arith.constant 0 : index
    %35 = vector.load %arg5[%c2_26, %c0_27, %c0_28] : memref<3x2x256xf32, #tpu.memory_space<vmem>>, vector<1x2x256xf32>
    %36 = vector.shape_cast %35 : vector<1x2x256xf32> to vector<2x256xf32>
    %37 = vector.shape_cast %34 : vector<2x256xf32> to vector<1x2x256xf32>
    tpu.vector_store %arg5[%c2_26, %c0_27, %c0_28], %37 {strides = array<i32>} : memref<3x2x256xf32, #tpu.memory_space<vmem>>, vector<1x2x256xf32>,
    %cst_29 = arith.constant dense<0.000000e+00> : vector<2x24xf32>
    %38 = tpu.matmul %34, %2, %cst_29 {dimension_numbers = #tpu.dot_dimension_numbers<[1], [0], [0], [1], [0, 0, 1, 1], [], []>} : vector<2x256xf32>, vector<256x24xf32>, vector<2x24xf32> -> vector<2x24xf32>
    %39 = vector.shape_cast %14 : vector<2x24xf32> to vector<1x2x24xf32>
    %40 = vector.shape_cast %26 : vector<2x24xf32> to vector<1x2x24xf32>
    %41 = vector.shape_cast %38 : vector<2x24xf32> to vector<1x2x24xf32>
    %42 = tpu.concatenate %39, %40, %41 in 0 : vector<1x2x24xf32>, vector<1x2x24xf32>, vector<1x2x24xf32> -> vector<3x2x24xf32>
    %c0_30 = arith.constant 0 : index
    %c0_31 = arith.constant 0 : index
    %c0_32 = arith.constant 0 : index
    %c0_33 = arith.constant 0 : index
    %43 = vector.load %arg6[%c0_30, %c0_31, %c0_32, %c0_33] : memref<1x3x2x24xf32, #tpu.memory_space<vmem>>, vector<1x3x2x24xf32>
    %44 = vector.shape_cast %43 : vector<1x3x2x24xf32> to vector<3x2x24xf32>
    %45 = vector.shape_cast %42 : vector<3x2x24xf32> to vector<1x3x2x24xf32>
    tpu.vector_store %arg6[%c0_30, %c0_31, %c0_32, %c0_33], %45 {strides = array<i32>} : memref<1x3x2x24xf32, #tpu.memory_space<vmem>>, vector<1x3x2x24xf32>,
    return
  }
  func.func @transform_0(%arg0: i32) -> (i32, i32) {
    %c0_i32 = arith.constant 0 : i32
    %c0_i32_0 = arith.constant 0 : i32
    %c0_i32_1 = arith.constant 0 : i32
    return %c0_i32, %c0_i32_0 : i32, i32
  }
  func.func @transform_1(%arg0: i32) -> (i32, i32, i32) {
    %c0_i32 = arith.constant 0 : i32
    %c0_i32_0 = arith.constant 0 : i32
    %c0_i32_1 = arith.constant 0 : i32
    return %c0_i32, %c0_i32_0, %arg0 : i32, i32, i32
  }
  func.func @transform_2(%arg0: i32) -> (i32, i32) {
    %c0_i32 = arith.constant 0 : i32
    %c0_i32_0 = arith.constant 0 : i32
    return %c0_i32, %arg0 : i32, i32
  }
  func.func @transform_3(%arg0: i32) -> (i32, i32) {
    %c0_i32 = arith.constant 0 : i32
    %c0_i32_0 = arith.constant 0 : i32
    return %arg0, %c0_i32 : i32, i32
  }
  func.func @transform_4(%arg0: i32) -> (i32, i32, i32) {
    %c0_i32 = arith.constant 0 : i32
    %c0_i32_0 = arith.constant 0 : i32
    %c0_i32_1 = arith.constant 0 : i32
    return %c0_i32, %c0_i32_0, %arg0 : i32, i32, i32
  }
  func.func @transform_5(%arg0: i32) -> (i32, i32, i32, i32) {
    %c0_i32 = arith.constant 0 : i32
    %c0_i32_0 = arith.constant 0 : i32
    %c0_i32_1 = arith.constant 0 : i32
    %c0_i32_2 = arith.constant 0 : i32
    return %arg0, %c0_i32, %c0_i32_0, %c0_i32_1 : i32, i32, i32, i32
  }
}

</mosaic_0001>

<bundles_post_ra>
// kernel: tpu_custom_call.1
= control target key start
LH: loop header
LB: loop body
LE: loop exit
PB: predicated region body
PF: predicated region fallthrough
CT: control target
= control target key end

     0   :  { %11 = vsyncpa [#allocation4], 0  ;;  %s1761_s0 = inlined_call_operand.vmem [shape: f32[2,10], index: 0, kind: input, shape index: {}]   ;;  %s1762_s1 = inlined_call_operand.vmem [shape: bf16[3,10,512], index: 1, kind: input, shape index: {}]   ;;  %s1763_s2 = inlined_call_operand.vmem [shape: f32[3,512], index: 2, kind: input, shape index: {}]   ;;  %s1764_s3 = inlined_call_operand.vmem [shape: f32[512,24], index: 3, kind: input, shape index: {}]   ;;  %s1765_s4 = inlined_call_operand.hbm [shape: f32[3,2,512], index: 4, kind: output, shape index: {0}]   ;;  %s1766_s5 = inlined_call_operand.hbm [shape: f32[2,3,2,24], index: 5, kind: output, shape index: {1}]  }
   0x1   :  { %13 = vsyncpa [#allocation4 + $0x1], 0 }
   0x2   :  { %14 = vsyncpa [#allocation6], 0 }
   0x3   :  { %16 = vsyncpa [#allocation6 + $0x1], 0  ;;  %s1436_s18 = smov 0   ;;  %s1438_s19 = smov 0  }
   0x4   :  { %s1440_s20 = smov 0   ;;  %s1442_s21 = smov 0  }
   0x5 LB: > { %s1457_s22 = sadd.s32 4294967295, %s1396_s21   ;;  %s997_s23 = sadd.s32 4294967294, %s1396_s21   ;;  %s1396_s21 = sphi %s1442_s21, %s1772_s21   ;;  %s1392_s20 = sphi %s1440_s20, %s1771_s20   ;;  %s1388_s19 = sphi %s1438_s19, %s1770_s19   ;;  %s1384_s18 = sphi %s1436_s18, %s1769_s18  }
   0x6   : > { %s1461_s24 = sadd.s32 1, %s1396_s21   ;;  %s50_s25 = sadd.s32 1, %s1392_s20 }
   0x7   : > { %s47_s26 = ssub.s32 %s1396_s21, %s1461_s24  ;;  %p57_p0 = scmp.ne.s32.totalorder %s1392_s20, %s1388_s19 }
   0x8   : > { %p48_p1 = scmp.eq.s32.totalorder %s47_s26, 0  ;;  %p58_p2 = scmp.eq.s32.totalorder %s1396_s21, 0 }
   0x9   : > { %p139_p3 = scmp.eq.s32.totalorder %s1457_s22, 1  ;;  %p144_p4 = scmp.ne.s32.totalorder %s1388_s19, %s1384_s18 }
   0xa   : > { %s1473_s27 = scalar_select %p48_p1, %s1392_s20, %s50_s25  }
   0xb   : > { %p59_p5 = por %p58_p2, %p57_p0  ;;  %p1475_p6 = por %p139_p3, %p57_p0 }
   0xc   : > { %p145_p7 = scmp.eq.s32.totalorder %s997_s23, 1  ;;  %p999_p9 = scmp.ge.s32.totalorder %s1396_s21, 2 }
   0xe   : > { %p1479_p8 = por %p145_p7, %p144_p4  ;;  %190 = sbr.rel (%p999_p9) target bundleno = 28 (0x1c), region = 20 }
  0x15   : > { %193 = sbr.rel (!%p59_p5) target bundleno = 28 (0x1c), region = 24  ;;  %s195_s30 = sand.u32 (%p59_p5), 1, %s1392_s20  }
  0x16   : > { %s1033_s6 = sshll.u32 (%p59_p5), %s1396_s21, 3  ;;  %s1238_s7 = smul.u32 (%p59_p5), 48, %s195_s30 }
  0x17   : > { %s200_s10 = scalar_lea.vmem (%p59_p5), %s1762_s1, %s1033_s6 }
  0x18   : > { %v238_v0 = vld [vmem:[%s200_s10] sm:$0xff] (%p59_p5)  ;;  %v240_v1 = vld [vmem:[%s200_s10 + $0x10] sm:$0xff] (%p59_p5)  ;;  %s197_s11 = scalar_lea.vmem (%p59_p5), [#allocation2], %s1238_s7 }
  0x19   : > { %v242_v2 = vld [vmem:[%s200_s10 + $0x20] sm:$0xff] (%p59_p5)  ;;  %v244_v3 = vld [vmem:[%s200_s10 + $0x30] sm:$0xff] (%p59_p5)  ;;  %239 = vst [vmem:[%s197_s11] sm:$0xff] (%p59_p5), %v238_v0  ;;  %241 = vst [vmem:[%s197_s11 + $0x8] sm:$0xff] (%p59_p5), %v240_v1 }
  0x1a   : > { %v246_v4 = vld [vmem:[%s200_s10 + $0x40] sm:$0xff] (%p59_p5)  ;;  %v248_v5 = vld [vmem:[%s200_s10 + $0x50] sm:$0xff] (%p59_p5)  ;;  %243 = vst [vmem:[%s197_s11 + $0x10] sm:$0xff] (%p59_p5), %v242_v2  ;;  %245 = vst [vmem:[%s197_s11 + $0x18] sm:$0xff] (%p59_p5), %v244_v3 }
  0x1b   : > { %247 = vst [vmem:[%s197_s11 + $0x20] sm:$0xff] (%p59_p5), %v246_v4  ;;  %249 = vst [vmem:[%s197_s11 + $0x28] sm:$0xff] (%p59_p5), %v248_v5 }
  0x1c PF: > { %p1002_p10 = scmp.ge.s32.totalorder %s1396_s21, 1  ;;  %p272_p11 = scmp.lt.s32.totalorder %s1396_s21, 3 }
  0x1e   : > { %p273_p12 = pnand %p1002_p10, %p272_p11 }
  0x1f   : > { %s1494_s12 = sand.u32 (!%p273_p12), 1, %s1388_s19   ;;  %v1398_v6 = vmov (!%p273_p12), 0   ;;  %s1005_s14 = sshll.u32 (!%p273_p12), %s1457_s22, 5  ;;  %vm396_vm0 = vcmask (!%p273_p12), 1044480   ;;  %v336_v7 = vld [vmem:[%s1761_s0] sm:$0x3] (!%p273_p12)  ;;  %v374_v0 = vlaneseq (!%p273_p12) }
  0x20   : > { %276 = sbr.rel (%p273_p12) target bundleno = 716 (0x2cc), region = 70  ;;  %435 = vmatprep.mubr.bf16.mxu0 (!%p273_p12), %v1398_v6  ;;  %p329_p13 = scmp.lt.s32.totalorder (!%p273_p12), %s1005_s14, 63  ;;  %v1510_v13 = vpack.c.bf16 (!%p273_p12), %v336_v7, %v336_v7  ;;  %vm392_vm1 = vcmask (!%p273_p12), 80896   ;;  %vm834_vm2 = vcmask (!%p273_p12), 189440  }
  0x21   : > { %s1239_s13 = smul.u32 (!%p273_p12), 48, %s1494_s12  ;;  %s1003_s6 = sshll.u32 (!%p273_p12), %s1457_s22, 1  ;;  %v375_v1 = vshrl.u32 (!%p273_p12), %v374_v0, 7 }
  0x22   : > { %p323_p0 = scmp.lt.s32.totalorder (!%p273_p12), %s1003_s6, 3  ;;  %s1240_s11 = smul.u32 (!%p273_p12), 12, %s1494_s12 }
  0x23   : > { %s1502_s17 = scalar_lea.vmem (!%p273_p12), [#allocation2], %s1239_s13  ;;  %v1629_v2 = vsub.s32 (!%p273_p12), 0, %v375_v1  ;;  %v1632_v4 = vsub.s32 (!%p273_p12), 1, %v375_v1 }
  0x24   : > { %v1293_v8 = vld [vmem:[%s1502_s17 + $0x4] ss:$8 sps:$4 sm:$0x1f] (!%p273_p12)   ;;  %v1295_v9 = vld [vmem:[%s1502_s17] ss:$8 sps:$4 sm:$0x1f] (!%p273_p12)  }
  0x25   : > { %1009 = vmatprep.subr.msk.bf16.mxu0 (!%p273_p12), %vm396_vm0, %v1293_v8  ;;  %v1296_v10 = vld [vmem:[%s1502_s17 + $0x14] ss:$8 sps:$4 sm:$0x1f] (!%p273_p12)   ;;  %v1298_v11 = vld [vmem:[%s1502_s17 + $0x10] ss:$8 sps:$4 sm:$0x1f] (!%p273_p12)  }
  0x26   : > { %v398_v12 = vsel (!%p273_p12), %vm396_vm0, %v1295_v9, 0  ;;  %v551_v14 = vsel (!%p273_p12), %vm396_vm0, %v1298_v11, 0  ;;  %v1299_v63 = vld [vmem:[%s1502_s17 + $0x24] ss:$8 sps:$4 sm:$0x1f] (!%p273_p12)   ;;  %s1639_s13 = scalar_lea.vmem (!%p273_p12), [#allocation3], %s1240_s11 }
  0x27   : > { %s1774_s14 = smov (!%p329_p13, %s1005_s14), 63  ;;  %404 = vmatpush1.bf16.msra.mxu0 %v398_v12  ;;  %s1776_s6 = smov (!%p323_p0, %s1003_s6), 3 }
  0x28   : > { %1017 = vmatprep.subr.msk.bf16.mxu0 %vm396_vm0, %v1296_v10  ;;  %s1006_s23 = sshll.u32 %s1774_s14, 3  ;;  %s1004_s7 = sshll.u32 %s1776_s6, 2 }
  0x29   : > { %s1517_s30 = scalar_lea.vmem %s1764_s3, %s1006_s23  ;;  %s1627_s10 = scalar_lea.vmem %s1763_s2, %s1004_s7 }
  0x2a   : > { %1010 = vmatmul.mubr.msk.bf16.vlgmr.msra.gmra.mrb[0].mxu0 %vm392_vm1, %v1510_v13  ;;  %v354_v15 = vld [vmem:[%s1517_s30 + $0x80] sm:$0xff]  ;;  %v355_v16 = vld [vmem:[%s1517_s30 + $0x88] sm:$0xff]  ;;  %v356_v20 = vld [vmem:[%s1517_s30 + $0x90] sm:$0xff]  ;;  %s1241_s14 = smul.u32 6, %s1494_s12  ;;  %s857_s16 = sshll.u32 %s1639_s13, 4  ;;  %s1676_s16 = int_to_ptr.vmem [resolvable:$true] %s857_s16 }
  0x2b   : > { %v338_v17 = vld [vmem:[%s1517_s30] sm:$0xff]  ;;  %557 = vmatpush1.bf16.msra.mxu0 %v551_v14  ;;  %588 = vmatprep.mubr.bf16.mxu0 %v1398_v6  ;;  %v1525_v18 = vpack.c.bf16 %v355_v16, %v354_v15  ;;  %v339_v19 = vld [vmem:[%s1517_s30 + $0x8] sm:$0xff]  ;;  %v357_v21 = vld [vmem:[%s1517_s30 + $0x98] sm:$0xff]  ;;  %s1302_s6 = scalar_lea.vmem %s1676_s16, 192  ;;  %s1399_s7 = smov [#allocation3]  }
  0x2c   : > { %v1530_v22 = vpack.c.bf16 %v339_v19, %v338_v17  ;;  %v1532_v23 = vpack.c.bf16 %v357_v21, %v356_v20  ;;  %v340_v24 = vld [vmem:[%s1517_s30 + $0x10] sm:$0xff]  ;;  %v341_v25 = vld [vmem:[%s1517_s30 + $0x18] sm:$0xff]  ;;  %v358_v26 = vld [vmem:[%s1517_s30 + $0xa0] sm:$0xff]  ;;  %s1665_s15 = scalar_lea.vmem [#allocation5], %s1241_s14  ;;  %p1303_p1 = scmp.ne.s32.totalorder %s1676_s16, %s1302_s6 }
  0x2d   : > { %1143 = vmatprep.subr.bf16.mxu1 %v1525_v18  ;;  %v359_v27 = vld [vmem:[%s1517_s30 + $0xa8] sm:$0xff]  ;;  %1175 = vmatprep.subr.bf16.mxu0 %v1525_v18  ;;  %v1541_v28 = vpack.c.bf16 %v341_v25, %v340_v24  ;;  %v342_v30 = vld [vmem:[%s1517_s30 + $0x20] sm:$0xff]  ;;  %v360_v32 = vld [vmem:[%s1517_s30 + $0xb0] sm:$0xff]  ;;  %s1306_s8 = sshll.u32 %s1399_s7, 4  ;;  %s1307_s8 = int_to_ptr.vmem [resolvable:$false] %s1306_s8 }
  0x2e   : > { %1145 = vmatpush3.bf16.msra.mxu1 %v1530_v22  ;;  %v1544_v29 = vpack.c.bf16 %v359_v27, %v358_v26  ;;  %v343_v31 = vld [vmem:[%s1517_s30 + $0x28] sm:$0xff]  ;;  %v361_v33 = vld [vmem:[%s1517_s30 + $0xb8] sm:$0xff]  ;;  %v344_v36 = vld [vmem:[%s1517_s30 + $0x30] sm:$0xff]  ;;  %p1304_p2 = pnand %p1303_p1, %p1475_p6  ;;  %s1308_s9 = scalar_lea.vmem %s1307_s8, 384 }
  0x2f   : > { %1147 = vmatprep.subr.bf16.mxu1 %v1532_v23  ;;  %v1553_v34 = vpack.c.bf16 %v343_v31, %v342_v30  ;;  %v1557_v35 = vpack.c.bf16 %v361_v33, %v360_v32  ;;  %v345_v37 = vld [vmem:[%s1517_s30 + $0x38] sm:$0xff]  ;;  %v362_v38 = vld [vmem:[%s1517_s30 + $0xc0] sm:$0xff]  ;;  %v363_v39 = vld [vmem:[%s1517_s30 + $0xc8] sm:$0xff]  ;;  %p1309_p4 = scmp.lt.s32.totalorder %s1676_s16, %s1307_s8  ;;  %p1310_p5 = scmp.lt.s32.totalorder %s1308_s9, %s1302_s6 }
  0x30   : > { %v1565_v40 = vpack.c.bf16 %v345_v37, %v344_v36  ;;  %v1569_v41 = vpack.c.bf16 %v363_v39, %v362_v38  ;;  %v346_v42 = vld [vmem:[%s1517_s30 + $0x40] sm:$0xff]  ;;  %v347_v43 = vld [vmem:[%s1517_s30 + $0x48] sm:$0xff]  ;;  %v364_v44 = vld [vmem:[%s1517_s30 + $0xd0] sm:$0xff]  ;;  %p1305_p3 = pneg %p1304_p2 }
  0x31   : > { %v365_v45 = vld [vmem:[%s1517_s30 + $0xd8] sm:$0xff]  ;;  %v1577_v46 = vpack.c.bf16 %v347_v43, %v346_v42  ;;  %v348_v48 = vld [vmem:[%s1517_s30 + $0x50] sm:$0xff]  ;;  %v366_v50 = vld [vmem:[%s1517_s30 + $0xe0] sm:$0xff]  ;;  %p1311_p7 = por %p1310_p5, %p1309_p4 }
  0x32   : > { %1018 = vmatmul.mubr.msk.bf16.vlgmr.msra.gmra.mrb[4].mxu0 %vm392_vm1, %v1510_v13  ;;  %1149 = vmatpush3.bf16.msra.mxu1 %v1541_v28  ;;  %v1581_v47 = vpack.c.bf16 %v365_v45, %v364_v44  ;;  %v349_v49 = vld [vmem:[%s1517_s30 + $0x58] sm:$0xff]  ;;  %v367_v51 = vld [vmem:[%s1517_s30 + $0xe8] sm:$0xff]  ;;  %v350_v54 = vld [vmem:[%s1517_s30 + $0x60] sm:$0xff] }
  0x33   : > { %1151 = vmatprep.subr.bf16.mxu1 %v1544_v29  ;;  %1177 = vmatpush3.bf16.msra.mxu0 %v1530_v22  ;;  %v1589_v52 = vpack.c.bf16 %v349_v49, %v348_v48  ;;  %v1593_v53 = vpack.c.bf16 %v367_v51, %v366_v50  ;;  %v351_v55 = vld [vmem:[%s1517_s30 + $0x68] sm:$0xff]  ;;  %v368_v57 = vld [vmem:[%s1517_s30 + $0xf0] sm:$0xff]  ;;  %v369_v58 = vld [vmem:[%s1517_s30 + $0xf8] sm:$0xff]  ;;  %p1312_p10 = pnand %p1311_p7, %p1305_p3 }
  0x34   : > { %1179 = vmatprep.subr.bf16.mxu0 %v1532_v23  ;;  %v1599_v56 = vpack.c.bf16 %v351_v55, %v350_v54  ;;  %v1610_v59 = vpack.c.bf16 %v369_v58, %v368_v57  ;;  %v352_v60 = vld [vmem:[%s1517_s30 + $0x70] sm:$0xff]  ;;  %v353_v61 = vld [vmem:[%s1517_s30 + $0x78] sm:$0xff]  ;;  %v372_v3 = vld [vmem:[%s1627_s10] ss:$4 sm:$0x3]  ;;  %s839_s30 = scalar_lea.sflag [#allocation4], %s1494_s12 }
  0x35   : > { %v1614_v62 = vpack.c.bf16 %v353_v61, %v352_v60  ;;  %v377_v5 = vrot.slane %v372_v3, %v1629_v2  ;;  %v381_v7 = vrot.slane %v372_v3, %v1632_v4  ;;  %v1014_v14 = vld [vmem:[%s1627_s10 + $0x1] ss:$4 sm:$0x3] }
  0x36   : > { %1153 = vmatpush3.bf16.msra.mxu1 %v1553_v34  ;;  %v535_v17 = vrot.slane %v1014_v14, %v1629_v2  ;;  %v1301_v19 = vld [vmem:[%s1502_s17 + $0x20] ss:$8 sps:$4 sm:$0x1f]   ;;  %s1036_s17 = sshll.u32 %s1457_s22, 6 }
  0x37   : > { %1155 = vmatprep.subr.bf16.mxu1 %v1557_v35  ;;  %1181 = vmatpush3.bf16.msra.mxu0 %v1541_v28  ;;  %v705_v30 = vsel %vm396_vm0, %v1301_v19, 0  ;;  %s1682_s26 = scalar_lea.hbm %s1765_s4, %s1036_s17 }
  0x38   : > { %1183 = vmatprep.subr.bf16.mxu0 %v1544_v29 }
  0x3a   : > { %1157 = vmatpush3.bf16.msra.mxu1 %v1565_v40 }
  0x3b   : > { %1159 = vmatprep.subr.bf16.mxu1 %v1569_v41  ;;  %1185 = vmatpush3.bf16.msra.mxu0 %v1553_v34 }
  0x3c   : > { %1187 = vmatprep.subr.bf16.mxu0 %v1557_v35 }
  0x3e   : > { %1161 = vmatpush3.bf16.msra.mxu1 %v1577_v46 }
  0x3f   : > { %1163 = vmatprep.subr.bf16.mxu1 %v1581_v47  ;;  %1189 = vmatpush3.bf16.msra.mxu0 %v1565_v40 }
  0x40   : > { %1191 = vmatprep.subr.bf16.mxu0 %v1569_v41 }
  0x42   : > { %1165 = vmatpush3.bf16.msra.mxu1 %v1589_v52 }
  0x43   : > { %1167 = vmatprep.subr.bf16.mxu1 %v1593_v53  ;;  %1193 = vmatpush3.bf16.msra.mxu0 %v1577_v46 }
  0x44   : > { %1195 = vmatprep.subr.bf16.mxu0 %v1581_v47 }
  0x46   : > { %1169 = vmatpush3.bf16.msra.mxu1 %v1599_v56 }
  0x47   : > { %1197 = vmatpush3.bf16.msra.mxu0 %v1589_v52  ;;  %1171 = vmatprep.subr.bf16.mxu1 %v1610_v59 }
  0x48   : > { %1199 = vmatprep.subr.bf16.mxu0 %v1593_v53 }
  0x4a   : > { %1173 = vmatpush3.bf16.msra.mxu1 %v1614_v62 }
  0x4b   : > { %1201 = vmatpush3.bf16.msra.mxu0 %v1599_v56  ;;  %1207 = vmatprep.subr.bf16.mxu1 %v1525_v18  ;;  %v539_v18 = vrot.slane %v1014_v14, %v1632_v4 }
  0x4c   : > { %1203 = vmatprep.subr.bf16.mxu0 %v1610_v59 }
  0x4f   : > { %1205 = vmatpush3.bf16.msra.mxu0 %v1614_v62 }
  0x50   : > { %1025 = vmatprep.subr.msk.bf16.mxu0 %vm396_vm0, %v1299_v63 }
  0xfd   : > { %v437_v8 = vpop.f32.mrb[0].mxu0 }
  0xfe   : > { %v438_v9 = vadd.f32 %v437_v8, %v377_v5  ;;  %v439_v10 = vpop.f32.mrb[1].mxu0 }
  0xff   : > { %v440_v11 = vadd.f32 %v439_v10, %v381_v7  ;;  %v441_v12 = vpop.f32.mrb[2].mxu0 }
 0x100   : > { %v442_v15 = vpop.f32.mrb[3].mxu0 }
 0x101   : > { %v446_v16 = vcombine.low %v438_v9, %v440_v11  ;;  %520 = vmatprep.mubr.f32.mxu1 %v440_v11 }
 0x102   : > { %521 = vmatmul.mubr.f32.vlgmr.msra.gmra.mrb[0].mxu1 %v438_v9 }
 0x103   : > { %1011 = vst.sshfl [vmem:[%s1639_s13] sm:$0x33 pattern:$0x76325410] %v446_v16  ;;  %1209 = vmatpush3.bf16.msra.mxu1 %v1530_v22 }
 0x104   : > { %1211 = vmatprep.subr.bf16.mxu1 %v1532_v23  ;;  %v1022_v23 = vld [vmem:[%s1627_s10 + $0x2] ss:$4 sm:$0x3] }
 0x105   : > { %v590_v20 = vpop.f32.mrb[4].mxu0  ;;  %v689_v32 = vrot.slane %v1022_v23, %v1629_v2 }
 0x106   : > { %v591_v21 = vadd.f32 %v590_v20, %v535_v17  ;;  %v592_v24 = vpop.f32.mrb[5].mxu0 }
 0x107   : > { %v593_v25 = vadd.f32 %v592_v24, %v539_v18  ;;  %v594_v26 = vpop.f32.mrb[6].mxu0  ;;  %1213 = vmatpush3.bf16.msra.mxu1 %v1541_v28 }
 0x108   : > { %v595_v27 = vpop.f32.mrb[7].mxu0  ;;  %1215 = vmatprep.subr.bf16.mxu1 %v1544_v29 }
 0x109   : > { %v599_v31 = vcombine.low %v591_v21, %v593_v25  ;;  %674 = vmatprep.mubr.f32.mxu0 %v593_v25 }
 0x10a   : > { %675 = vmatmul.mubr.f32.vlgmr.msra.gmra.mrb[8].mxu0 %v591_v21 }
 0x10b   : > { %1034 = vst.sshfl [vmem:[%s1639_s13 + $0x4] sm:$0x33 pattern:$0x76325410] %v599_v31  ;;  %711 = vmatpush1.bf16.msra.mxu0 %v705_v30  ;;  %742 = vmatprep.mubr.bf16.mxu0 %v1398_v6 }
 0x10c   : > { %1217 = vmatpush3.bf16.msra.mxu1 %v1553_v34  ;;  %v693_v34 = vrot.slane %v1022_v23, %v1632_v4 }
 0x10d   : > { %1219 = vmatprep.subr.bf16.mxu1 %v1557_v35 }
 0x10e   : > { %1026 = vmatmul.mubr.msk.bf16.vlgmr.msra.gmra.mrb[12].mxu0 %vm392_vm1, %v1510_v13 }
 0x110   : > { %1221 = vmatpush3.bf16.msra.mxu1 %v1565_v40 }
 0x111   : > { %1223 = vmatprep.subr.bf16.mxu1 %v1569_v41 }
 0x114   : > { %1225 = vmatpush3.bf16.msra.mxu1 %v1577_v46 }
 0x115   : > { %1227 = vmatprep.subr.bf16.mxu1 %v1581_v47 }
 0x118   : > { %1229 = vmatpush3.bf16.msra.mxu1 %v1589_v52 }
 0x119   : > { %1231 = vmatprep.subr.bf16.mxu1 %v1593_v53 }
 0x11c   : > { %1233 = vmatpush3.bf16.msra.mxu1 %v1599_v56 }
 0x11d   : > { %1235 = vmatprep.subr.bf16.mxu1 %v1610_v59 }
 0x120   : > { %1237 = vmatpush3.bf16.msra.mxu1 %v1614_v62 }
 0x1d5   : > { %v1069_v6 = vpop.f32.mrb[0].mxu1 }
 0x1d6   : > { %v1070_v13 = vpop.f32.mrb[1].mxu1 }
 0x1d7   : > { %v1071_v22 = vadd.f32 %v1070_v13, %v1069_v6 }
 0x1d9   : > { %835 = vst.msk [vmem:[%s1665_s15] sm:$0x3] %vm834_vm2, %v1071_v22 }
 0x1dd   : > { %v1104_v28 = vpop.f32.mrb[8].mxu0 }
 0x1de   : > { %v1105_v29 = vpop.f32.mrb[9].mxu0 }
 0x1df   : > { %v1106_v33 = vadd.f32 %v1105_v29, %v1104_v28 }
 0x1e1   : > { %836 = vst.msk [vmem:[%s1665_s15 + $0x2] sm:$0x3] %vm834_vm2, %v1106_v33  ;;  %v744_v35 = vpop.f32.mrb[12].mxu0 }
 0x1e2   : > { %v745_v36 = vadd.f32 %v744_v35, %v689_v32  ;;  %v746_v37 = vpop.f32.mrb[13].mxu0 }
 0x1e3   : > { %v747_v38 = vadd.f32 %v746_v37, %v693_v34  ;;  %v748_v39 = vpop.f32.mrb[14].mxu0 }
 0x1e4   : > { %v749_v40 = vpop.f32.mrb[15].mxu0 }
 0x1e5   : > { %v753_v41 = vcombine.low %v745_v36, %v747_v38  ;;  %828 = vmatprep.mubr.f32.mxu1 %v747_v38 }
 0x1e6   : > { %829 = vmatmul.mubr.f32.vlgmr.msra.gmra.mrb[2].mxu1 %v745_v36 }
 0x1e7   : > { %1035 = vst.sshfl [vmem:[%s1639_s13 + $0x8] sm:$0x33 pattern:$0x76325410] %v753_v41 }
 0x1e8   : > { %1315 = shalt.err (!%p1312_p10)
}
 0x1e9   : > { %s1316_s10 = scalar_lea.hbm %s1682_s26, 192  ;;  %s1320_s14 = scalar_lea.hbm %s1765_s4, 384 }
 0x1ea   : > { %p1317_p11 = scmp.ne.s32.totalorder %s1682_s26, %s1316_s10  ;;  %p1321_p0 = scmp.lt.u32.totalorder %s1682_s26, %s1765_s4 }
 0x1eb   : > { %p1322_p1 = scmp.lt.u32.totalorder %s1320_s14, %s1316_s10  ;;  %p1324_p3 = scmp.lt.u32.totalorder %s1316_s10, %s1682_s26 }
 0x1ec   : > { %p1318_p12 = pnand %p1317_p11, %p1475_p6 }
 0x1ed   : > { %p1323_p2 = por %p1322_p1, %p1321_p0 }
 0x1ee   : > { %p1319_p13 = pneg %p1318_p12 }
 0x1ef   : > { %p1325_p4 = por %p1324_p3, %p1323_p2 }
 0x1f1   : > { %p1326_p5 = pnand %p1325_p4, %p1319_p13 }
 0x1f3   : > { %1329 = shalt.err (!%p1326_p5)
}
 0x1f4   : > { %s1400_s25 = smov 64   ;;  %s1401_s6 = smov 128  }
 0x1f5   : > { %s1402_s7 = smov 4   ;;  %s873_s8 = sshll.u32 %s1665_s15, 4  ;;  %s1710_s8 = int_to_ptr.vmem [resolvable:$true] %s873_s8 }
 0x1f6   : > { %1243 = dma.vmem_to_hbm [thread:$0]  (%p1475_p6), %s1676_s16, 192, %s1682_s26, %s839_s30, %s1400_s25, %s1401_s6, %s1402_s7  }
 0x1f7   : > { %s1242_s9 = smul.u32 96, %s1457_s22  ;;  %s844_s14 = scalar_lea.sflag [#allocation6], %s1494_s12 }
 0x1f8   : > { %s1330_s17 = scalar_lea.vmem %s1710_s8, 96  ;;  %s1403_s22 = smov [#allocation5]  }
 0x1f9   : > { %s1715_s13 = scalar_lea.hbm %s1766_s5, %s1242_s9  ;;  %p1331_p7 = scmp.ne.s32.totalorder %s1710_s8, %s1330_s17 }
 0x1fa   : > { %s1334_s16 = sshll.u32 %s1403_s22, 4  ;;  %s1335_s16 = int_to_ptr.vmem [resolvable:$false] %s1334_s16 }
 0x1fb   : > { %p1332_p10 = pnand %p1331_p7, %p1475_p6  ;;  %s1336_s26 = scalar_lea.vmem %s1335_s16, 192 }
 0x1fc   : > { %p1337_p12 = scmp.lt.s32.totalorder %s1710_s8, %s1335_s16  ;;  %p1338_p13 = scmp.lt.s32.totalorder %s1336_s26, %s1330_s17 }
 0x1fd   : > { %p1333_p11 = pneg %p1332_p10 }
 0x1fe   : > { %p1339_p0 = por %p1338_p13, %p1337_p12 }
 0x200   : > { %p1340_p1 = pnand %p1339_p0, %p1333_p11 }
 0x2b9   : > { %v1139_v42 = vpop.f32.mrb[2].mxu1 }
 0x2ba   : > { %v1140_v43 = vpop.f32.mrb[3].mxu1 }
 0x2bb   : > { %v1141_v44 = vadd.f32 %v1140_v43, %v1139_v42 }
 0x2bd   : > { %837 = vst.msk [vmem:[%s1665_s15 + $0x4] sm:$0x3] %vm834_vm2, %v1141_v44 }
 0x2be   : > { %1343 = shalt.err (!%p1340_p1)
}
 0x2bf   : > { %s1344_s15 = scalar_lea.hbm %s1715_s13, 96  ;;  %s1348_s25 = scalar_lea.hbm %s1766_s5, 192 }
 0x2c0   : > { %p1345_p2 = scmp.ne.s32.totalorder %s1715_s13, %s1344_s15  ;;  %p1349_p5 = scmp.lt.u32.totalorder %s1715_s13, %s1766_s5 }
 0x2c1   : > { %p1350_p7 = scmp.lt.u32.totalorder %s1348_s25, %s1344_s15  ;;  %p1352_p11 = scmp.lt.u32.totalorder %s1344_s15, %s1715_s13 }
 0x2c2   : > { %p1346_p3 = pnand %p1345_p2, %p1475_p6 }
 0x2c3   : > { %p1351_p10 = por %p1350_p7, %p1349_p5 }
 0x2c4   : > { %p1347_p4 = pneg %p1346_p3 }
 0x2c5   : > { %p1353_p12 = por %p1352_p11, %p1351_p10 }
 0x2c7   : > { %p1354_p13 = pnand %p1353_p12, %p1347_p4 }
 0x2c9   : > { %1357 = shalt.err (!%p1354_p13)
}
 0x2ca   : > { %s1404_s9 = smov 32   ;;  %s1405_s10 = smov 2  }
 0x2cb   : > { %1244 = dma.vmem_to_hbm [thread:$0]  (%p1475_p6), %s1710_s8, 96, %s1715_s13, %s844_s14, %s1404_s9, %s1404_s9, %s1405_s10  }
 0x2cc PF: > { %s888_s11 = sand.u32 1, %s1384_s18   ;;  %p1248_p0 = pnand %p999_p9, %p1479_p8 }
 0x2cd   : > { %s889_s17 = scalar_lea.sflag [#allocation4], %s888_s11 }
 0x2ce   : > { %1375 = dma.done.wait (!%p1248_p0), %s889_s17, 192  }
 0x2cf   : > { %1377 = vsyncadd (!%p1248_p0), %s889_s17, 4294967104  ;;  %s898_s22 = scalar_lea.sflag [#allocation6], %s888_s11 }
 0x2d0   : > { %1379 = dma.done.wait (!%p1248_p0), %s898_s22, 96  }
 0x2d1   : > { %1381 = vsyncadd (!%p1248_p0), %s898_s22, 4294967200  ;;  %p19_p6 = scmp.ge.s32.totalorder %s1461_s24, 4   ;;  %s1769_s18 = smov %s1388_s19 }
 0x2d2   : > { %s1770_s19 = smov %s1392_s20  ;;  %s1771_s20 = smov %s1473_s27 }
 0x2d3   : > { %s1772_s21 = smov %s1461_s24  ;;  %21 = sbr.rel (!%p19_p6) target bundleno = 5 (0x5), region = 143 }
 0x2da   :  { %903 = vsyncpa [#allocation4], 1 }
 0x2db   :  { %905 = vsyncpa [#allocation4 + $0x1], 1 }
 0x2dc   :  { %906 = vsyncpa [#allocation6], 1 }
 0x2dd   :  { %908 = vsyncpa [#allocation6 + $0x1], 1 }

</bundles_post_ra>
